<compile_context>
chip_gen: v7x
topology: tpu7x:2x2x1
jax: 0.10.0
libtpu: 0.0.40
codegen_flags: <defaults>
</compile_context>

<pallas_src>
import functools

import jax
import jax.numpy as jnp
from jax import lax
from jax.experimental import pallas as pl
from jax.experimental.pallas import tpu as pltpu


def _vmem_budget(block_bytes, scratch_bytes=0):
    """Per-call scoped-VMEM budget: 2 pipeline buffers per block + in-kernel
    temporaries + margin, clamped to a sane range."""
    est = 2 * block_bytes + scratch_bytes + (4 << 20)
    return int(min(max(est, 32 << 20), 96 << 20))


# ---------------------------------------------------------------------------
# Kernel 1: 3-NN inverse-distance-weighted feature interpolation.
# grid = (B, Np // TM); each step writes a channels-first [D2, TM] tile.
# ---------------------------------------------------------------------------
def interp_kernel(xyz1_ref, xyz2t_ref, n1_ref, n2_ref, pts2_ref, out_ref, *,
                  compute_dtype):
    x1 = xyz1_ref[0]          # [3, TM]  query coords (native channels-first)
    x2t = xyz2t_ref[0]        # [S, 3]   sampled coords (rows = samples)
    n1 = n1_ref[0]            # [1, TM]  |x1|^2 per query
    n2 = n2_ref[0]            # [S, 1]   |x2|^2 per sample
    p2 = pts2_ref[0]          # [D2, S]  sampled features (already compute_dtype)

    s, tm = x2t.shape[0], x1.shape[1]
    k = min(3, s)

    # Pairwise squared distances on the MXU (it is otherwise idle here):
    #   dT[s, t] = |x2_s|^2 + |x1_t|^2 - 2 <x2_s, x1_t>
    crossT = jnp.dot(x2t, x1, preferred_element_type=jnp.float32)      # [S, TM]
    # Clamp >= 0 BEFORE the bitcast key pack (norm expansion can go slightly
    # negative, which would break signed-int monotonicity).
    dT = jnp.maximum(n2 + n1 - 2.0 * crossT, 0.0)

    # Pack (distance, sample index) into one sortable int32 key: dT >= 0 so its
    # f32 bit pattern is monotone as a signed int; low bits carry the sample
    # index (unique per column => unambiguous one-hot, built-in tie-break).
    # Note: the recovered dmin has its low idx_bits mantissa bits truncated.
    idx_bits = max(1, (s - 1).bit_length())
    hi_mask = jnp.int32(~((1 << idx_bits) - 1))
    row = lax.broadcasted_iota(jnp.int32, (s, tm), 0)
    key = (pltpu.bitcast(dT, jnp.int32) & hi_mask) | row

    # K smallest neighbours: one cross-sublane min per step; dense one-hot
    # weights feed a single MXU matmul against the feature matrix.
    wsumT = jnp.zeros((s, tm), jnp.float32)
    rsum = jnp.zeros((1, tm), jnp.float32)
    for i in range(k):                                       # static unroll, k <= 3
        kmin = jnp.min(key, axis=0, keepdims=True)           # [1, TM]
        sel = key == kmin                                     # one True per column
        dmin = pltpu.bitcast(kmin & hi_mask, jnp.float32)     # recover distance
        r = 1.0 / jnp.maximum(dmin, 1e-6)
        wsumT = wsumT + jnp.where(sel, r, 0.0)
        rsum = rsum + r
        if i + 1 < k:                                         # skip mask on last iter
            key = jnp.where(sel, jnp.int32(2147483647), key)

    wT = (wsumT * (1.0 / rsum)).astype(compute_dtype)         # normalized [S, TM]
    acc = jnp.dot(p2, wT, preferred_element_type=jnp.float32)  # [D2, TM] on MXU
    out_ref[0] = acc.astype(out_ref.dtype)


# ---------------------------------------------------------------------------
# Kernel 2: one MLP stage (Conv1d k=1, channels-first), fused with the
# previous layer's BatchNorm affine + ReLU and with per-tile BN partial stats.
#   inputs : x_0..x_{n_x-1}  [1, Cin_i, TM]   (n_x == 2 fuses the channel concat)
#            (scale, shift)  [Cin, 1]         only if act
#            w_0..w_{n_x-1}  [Cout, Cin_i], bias [Cout, 1]
#   outputs: z [1, Cout, TM], partial sum / sum-of-squares [1, 1, Cout, 1]
# ---------------------------------------------------------------------------
def mlp_stage_kernel(*refs, n_x, act, tm, n_valid, masked, compute_dtype):
    xs = refs[:n_x]
    pos = n_x
    if act:
        scale_ref, shift_ref = refs[pos], refs[pos + 1]
        pos += 2
    ws = refs[pos:pos + n_x]
    b_ref = refs[pos + n_x]
    z_ref, ssum_ref, ssq_ref = refs[pos + n_x + 1:pos + n_x + 4]

    acc = None
    for x_ref, w_ref in zip(xs, ws):
        x = x_ref[0]                                          # [Cin_i, TM]
        if act:                                               # BN affine + ReLU
            x = jnp.maximum(x.astype(jnp.float32) * scale_ref[...] + shift_ref[...], 0.0)
            x = x.astype(compute_dtype)
        part = jnp.dot(w_ref[...], x, preferred_element_type=jnp.float32)  # [Cout, TM]
        acc = part if acc is None else acc + part
    z = acc + b_ref[...]                                      # conv1x1 bias
    z_ref[0] = z.astype(z_ref.dtype)

    if masked:   # mask padded columns out of the BatchNorm statistics
        col = lax.broadcasted_iota(jnp.int32, (1, tm), 1) + pl.program_id(1) * tm
        zm = jnp.where(col < n_valid, z, 0.0)
    else:
        zm = z
    ssum_ref[0, 0] = jnp.sum(zm, axis=-1, keepdims=True)      # [Cout, 1]
    ssq_ref[0, 0] = jnp.sum(zm * z, axis=-1, keepdims=True)   # [Cout, 1]


# ---------------------------------------------------------------------------
# Kernel 3: final BatchNorm (folded affine) + ReLU, channels-first output
# (this IS the module's output layout -> no trailing transpose).
# ---------------------------------------------------------------------------
def bn_relu_kernel(x_ref, scale_ref, shift_ref, o_ref):
    x = x_ref[0].astype(jnp.float32)
    o_ref[0] = jnp.maximum(x * scale_ref[...] + shift_ref[...], 0.0).astype(o_ref.dtype)


# ---------------------------------------------------------------------------
# Wrapper.
# ---------------------------------------------------------------------------
def pointnet_fp_forward(xyz1, xyz2, points1, points2, params, *,
                        compute_dtype=jnp.float32, tile_n=512):
    """xyz1:[B,C,N]  xyz2:[B,C,S]  points1:[B,D1,N] or None  points2:[B,D2,S]
       returns new_points: [B, mlp[-1], N].
       tile_n: row tile (lane dim); 512 is v7x-safe, v5e/v6e can use 1024."""
    assert tile_n % 128 == 0
    B, C, N = xyz1.shape
    S = xyz2.shape[2]
    D2 = points2.shape[1]
    cd_bytes = jnp.dtype(compute_dtype).itemsize

    # Row tiling: tm is a multiple of 128 (or the whole row dim for small N);
    # awkward N is zero-padded and masked out of the BN statistics.
    if N <= tile_n:
        tm, n_padded = N, N
    else:
        tm = tile_n
        n_padded = pl.cdiv(N, tm) * tm
    pad = n_padded - N
    mt = n_padded // tm
    masked = pad > 0
    R = B * N

    xyz1f = xyz1.astype(jnp.float32)
    xyz2f = xyz2.astype(jnp.float32)
    if pad:
        xyz1f = jnp.pad(xyz1f, ((0, 0), (0, 0), (0, pad)))
    # Tiny precomputations (keep coords/norms in f32 for distance accuracy).
    n1 = jnp.sum(xyz1f * xyz1f, axis=1, keepdims=True)        # [B, 1, Np]
    n2 = jnp.sum(xyz2f * xyz2f, axis=1)[..., None]            # [B, S, 1]
    xyz2t = jnp.transpose(xyz2f, (0, 2, 1))                   # [B, S, 3] (tiny)
    p2cf = points2.astype(compute_dtype)                      # native [B, D2, S]

    if S == 1:
        interpolated = jnp.broadcast_to(p2cf, (B, D2, n_padded)).astype(compute_dtype)
    else:
        blk = (3 * tm + 3 * S + tm + S) * 4 + (S * D2 + D2 * tm) * cd_bytes
        scratch = 10 * S * tm * 4                             # [S, TM] temporaries
        interpolated = pl.pallas_call(
            functools.partial(interp_kernel, compute_dtype=compute_dtype),
            out_shape=jax.ShapeDtypeStruct((B, D2, n_padded), compute_dtype),
            grid=(B, mt),
            in_specs=[
                pl.BlockSpec((1, C, tm), lambda b, n: (b, 0, n)),
                pl.BlockSpec((1, S, C), lambda b, n: (b, 0, 0)),
                pl.BlockSpec((1, 1, tm), lambda b, n: (b, 0, n)),
                pl.BlockSpec((1, S, 1), lambda b, n: (b, 0, 0)),
                pl.BlockSpec((1, D2, S), lambda b, n: (b, 0, 0)),
            ],
            out_specs=pl.BlockSpec((1, D2, tm), lambda b, n: (b, 0, n)),
            compiler_params=pltpu.CompilerParams(
                dimension_semantics=("parallel", "parallel"),
                vmem_limit_bytes=_vmem_budget(blk, scratch)),
        )(xyz1f, xyz2t, n1, n2, p2cf)                         # [B, D2, Np]

    # ------------------- MLP: Conv1d(k=1) + BN(train) + ReLU -------------------
    if points1 is not None:
        p1cf = points1.astype(compute_dtype)                  # native layout, one cast
        if pad:
            p1cf = jnp.pad(p1cf, ((0, 0), (0, 0), (0, pad)))
        x_inputs = [p1cf, interpolated]      # concat fused into the first matmul
    else:
        x_inputs = [interpolated]

    scale = shift = None
    z = None
    cout = None
    for li, (w_t, bias, gamma, beta) in enumerate(params):
        cin_total, cout = w_t.shape
        act = li > 0                          # first layer consumes raw features
        n_x = len(x_inputs)
        assert not (act and n_x > 1)

        # Split + pre-transpose + pre-cast the weights ONCE in the wrapper.
        w_parts, off = [], 0
        for x in x_inputs:
            ci = x.shape[1]
            w_parts.append(jnp.transpose(w_t[off:off + ci]).astype(compute_dtype))
            off += ci
        assert off == cin_total
        b_cf = bias.reshape(cout, 1).astype(jnp.float32)

        in_arrays = list(x_inputs)
        in_specs = [pl.BlockSpec((1, x.shape[1], tm), lambda b, m: (b, 0, m))
                    for x in x_inputs]
        if act:
            cprev = scale.shape[0]
            in_arrays += [scale, shift]
            in_specs += [pl.BlockSpec((cprev, 1), lambda b, m: (0, 0))] * 2
        in_arrays += w_parts + [b_cf]
        in_specs += [pl.BlockSpec(w.shape, lambda b, m: (0, 0)) for w in w_parts]
        in_specs += [pl.BlockSpec((cout, 1), lambda b, m: (0, 0))]

        blk = sum(x.shape[1] * tm * cd_bytes for x in x_inputs)
        blk += sum(int(w.size) * cd_bytes for w in w_parts)
        blk += cout * tm * cd_bytes + 3 * cout * 4
        blk += 2 * scale.shape[0] * 4 if act else 0
        scratch = (3 * cout + 2 * cin_total) * tm * 4

        z, ssum, ssq = pl.pallas_call(
            functools.partial(mlp_stage_kernel, n_x=n_x, act=act, tm=tm,
                              n_valid=N, masked=masked, compute_dtype=compute_dtype),
            out_shape=(jax.ShapeDtypeStruct((B, cout, n_padded), compute_dtype),
                       jax.ShapeDtypeStruct((B, mt, cout, 1), jnp.float32),
                       jax.ShapeDtypeStruct((B, mt, cout, 1), jnp.float32)),
            grid=(B, mt),
            in_specs=in_specs,
            out_specs=(pl.BlockSpec((1, cout, tm), lambda b, m: (b, 0, m)),
                       pl.BlockSpec((1, 1, cout, 1), lambda b, m: (b, m, 0, 0)),
                       pl.BlockSpec((1, 1, cout, 1), lambda b, m: (b, m, 0, 0))),
            compiler_params=pltpu.CompilerParams(
                dimension_semantics=("parallel", "parallel"),
                vmem_limit_bytes=_vmem_budget(blk, scratch)),
        )(*in_arrays)

        # Global BatchNorm training statistics over the R = B*N real rows
        # (biased variance, eps=1e-5), folded into a per-channel affine applied
        # by the next stage.  This [Cout]-sized reduction runs in plain JAX.
        mean = jnp.sum(ssum, axis=(0, 1, 3)) / R
        var = jnp.maximum(jnp.sum(ssq, axis=(0, 1, 3)) / R - mean * mean, 0.0)
        inv = lax.rsqrt(var + 1e-5)
        g = gamma.reshape(-1)
        scale = (g * inv).reshape(cout, 1).astype(jnp.float32)
        shift = (beta.reshape(-1) - mean * g * inv).reshape(cout, 1).astype(jnp.float32)

        x_inputs = [z]

    # Final normalize + ReLU; output is already [B, Cout, N] channels-first.
    blk = 2 * cout * tm * 4 + 2 * cout * 4
    y = pl.pallas_call(
        bn_relu_kernel,
        out_shape=jax.ShapeDtypeStruct((B, cout, n_padded), jnp.float32),
        grid=(B, mt),
        in_specs=[pl.BlockSpec((1, cout, tm), lambda b, m: (b, 0, m)),
                  pl.BlockSpec((cout, 1), lambda b, m: (0, 0)),
                  pl.BlockSpec((cout, 1), lambda b, m: (0, 0))],
        out_specs=pl.BlockSpec((1, cout, tm), lambda b, m: (b, 0, m)),
        compiler_params=pltpu.CompilerParams(
            dimension_semantics=("parallel", "parallel"),
            vmem_limit_bytes=_vmem_budget(blk)),
    )(z, scale, shift)

    if pad:
        y = y[:, :, :N]
    return y                                   # [B, mlp[-1], N]


# ---------------------------------------------------------------------------
# Pure-JAX reference (same math, no Pallas) for correctness checking.
# ---------------------------------------------------------------------------
def reference_forward(xyz1, xyz2, points1, points2, params):
    x1 = jnp.transpose(xyz1, (0, 2, 1)).astype(jnp.float32)
    x2 = jnp.transpose(xyz2, (0, 2, 1)).astype(jnp.float32)
    p2 = jnp.transpose(points2, (0, 2, 1)).astype(jnp.float32)
    B, N, _ = x1.shape
    S = x2.shape[1]
    d = (jnp.sum(x1 ** 2, -1)[..., None] + jnp.sum(x2 ** 2, -1)[:, None, :]
         - 2.0 * jnp.einsum("bnc,bsc->bns", x1, x2))
    K = min(3, S)
    neg_d, idx = lax.top_k(-d, K)
    dists = -neg_d
    recip = 1.0 / jnp.maximum(dists, 1e-6)
    weight = recip / jnp.sum(recip, -1, keepdims=True)            # [B, N, K]
    gathered = jax.vmap(lambda feats, ii: feats[ii])(p2, idx)     # [B, N, K, D2]
    interp = jnp.sum(gathered * weight[..., None], axis=2)        # [B, N, D2]
    if points1 is not None:
        p1 = jnp.transpose(points1, (0, 2, 1)).astype(jnp.float32)
        new_points = jnp.concatenate([p1, interp], axis=-1)
    else:
        new_points = interp
    x = new_points.reshape(B * N, -1)
    for (w_t, bias, gamma, beta) in params:
        z = x @ w_t + bias
        mean = z.mean(0, keepdims=True)
        var = ((z - mean) ** 2).mean(0, keepdims=True)            # biased var
        x = jnp.maximum((z - mean) * lax.rsqrt(var + 1e-5) * gamma + beta, 0.0)
    return x.reshape(B, N, -1).transpose(0, 2, 1)


def init_params(key, in_channel, mlp):
    """Conv1d(kernel=1) weight stored transposed as [Cin, Cout];
       BatchNorm1d gamma/beta as [1, Cout]."""
    params = []
    last = in_channel
    for out_ch in mlp:
        key, k1, k2, k3, k4 = jax.random.split(key, 5)
        w = jax.random.normal(k1, (last, out_ch), jnp.float32) * (1.0 / jnp.sqrt(last))
        b = jax.random.normal(k2, (1, out_ch), jnp.float32) * 0.05
        g = 1.0 + 0.1 * jax.random.normal(k3, (1, out_ch), jnp.float32)
        beta = 0.1 * jax.random.normal(k4, (1, out_ch), jnp.float32)
        params.append((w, b, g, beta))
        last = out_ch
    return params


if __name__ == "__main__":
    key = jax.random.PRNGKey(0)
    B, C, N, S = 2, 3, 16, 8
    D1, D2 = 16, 16
    in_channel = D1 + D2                      # points1 channels + points2 channels
    mlp = [32, 16]

    k1, k2, k3, k4, k5 = jax.random.split(key, 5)
    xyz1 = jax.random.normal(k1, (B, C, N), jnp.float32)
    xyz2 = jax.random.normal(k2, (B, C, S), jnp.float32)
    points1 = jax.random.normal(k3, (B, D1, N), jnp.float32)
    points2 = jax.random.normal(k4, (B, D2, S), jnp.float32)
    params = init_params(k5, in_channel, mlp)

    ref = jax.block_until_ready(
        reference_forward(xyz1, xyz2, points1, points2, params))

    # f32 path (tight match against the reference).
    out = jax.block_until_ready(
        pointnet_fp_forward(xyz1, xyz2, points1, points2, params))
    assert out.shape == (B, mlp[-1], N), out.shape
    assert jnp.allclose(out, ref, atol=2e-3, rtol=2e-3), (
        float(jnp.max(jnp.abs(out - ref))))

    # bf16 activation/operand path (production setting for v6e/v7x).
    out_bf16 = jax.block_until_ready(
        pointnet_fp_forward(xyz1, xyz2, points1, points2, params,
                            compute_dtype=jnp.bfloat16))
    assert out_bf16.shape == (B, mlp[-1], N), out_bf16.shape
    assert jnp.allclose(out_bf16, ref, atol=1e-1, rtol=1e-1), (
        float(jnp.max(jnp.abs(out_bf16 - ref))))

    # Padded / masked-statistics path (N not a multiple of the row tile).
    Nn = 160
    k6, k7, _ = jax.random.split(k5, 3)
    xyz1b = jax.random.normal(k6, (B, C, Nn), jnp.float32)
    points1b = jax.random.normal(k7, (B, D1, Nn), jnp.float32)
    refb = jax.block_until_ready(
        reference_forward(xyz1b, xyz2, points1b, points2, params))
    outb = jax.block_until_ready(
        pointnet_fp_forward(xyz1b, xyz2, points1b, points2, params, tile_n=128))
    assert outb.shape == (B, mlp[-1], Nn), outb.shape
    assert jnp.allclose(outb, refb, atol=2e-3, rtol=2e-3), (
        float(jnp.max(jnp.abs(outb - refb))))

    print("KERNEL_OK")
</pallas_src>

<mosaic_0001>
module attributes {stable_mosaic.version = 11 : i64} {
  func.func @interp_kernel(%arg0: i32, %arg1: i32, %arg2: memref<1x3x16xf32, #tpu.memory_space<vmem>>, %arg3: memref<1x8x3xf32, #tpu.memory_space<vmem>>, %arg4: memref<1x1x16xf32, #tpu.memory_space<vmem>>, %arg5: memref<1x8x1xf32, #tpu.memory_space<vmem>>, %arg6: memref<1x16x8xf32, #tpu.memory_space<vmem>>, %arg7: memref<1x16x16xf32, #tpu.memory_space<vmem>>) attributes {dimension_semantics = [#tpu.dimension_semantics<parallel>, #tpu.dimension_semantics<parallel>], iteration_bounds = array<i64: 2, 1>, scalar_prefetch = 0 : i64, scratch_operands = 0 : i64, tpu.core_type = #tpu.core_type<tc>, window_params = [{transform_indices = @transform_0, window_bounds = array<i64: 1, 3, 16>}, {transform_indices = @transform_1, window_bounds = array<i64: 1, 8, 3>}, {transform_indices = @transform_2, window_bounds = array<i64: 1, 1, 16>}, {transform_indices = @transform_3, window_bounds = array<i64: 1, 8, 1>}, {transform_indices = @transform_4, window_bounds = array<i64: 1, 16, 8>}, {transform_indices = @transform_5, window_bounds = array<i64: 1, 16, 16>}]} {
    %c0 = arith.constant 0 : index
    %c0_0 = arith.constant 0 : index
    %c0_1 = arith.constant 0 : index
    %0 = vector.load %arg2[%c0, %c0_0, %c0_1] : memref<1x3x16xf32, #tpu.memory_space<vmem>>, vector<1x3x16xf32>
    %1 = vector.shape_cast %0 : vector<1x3x16xf32> to vector<3x16xf32>
    %c0_2 = arith.constant 0 : index
    %c0_3 = arith.constant 0 : index
    %c0_4 = arith.constant 0 : index
    %2 = vector.load %arg3[%c0_2, %c0_3, %c0_4] : memref<1x8x3xf32, #tpu.memory_space<vmem>>, vector<1x8x3xf32>
    %3 = vector.shape_cast %2 : vector<1x8x3xf32> to vector<8x3xf32>
    %c0_5 = arith.constant 0 : index
    %c0_6 = arith.constant 0 : index
    %c0_7 = arith.constant 0 : index
    %4 = vector.load %arg4[%c0_5, %c0_6, %c0_7] : memref<1x1x16xf32, #tpu.memory_space<vmem>>, vector<1x1x16xf32>
    %5 = vector.shape_cast %4 : vector<1x1x16xf32> to vector<1x16xf32>
    %c0_8 = arith.constant 0 : index
    %c0_9 = arith.constant 0 : index
    %c0_10 = arith.constant 0 : index
    %6 = vector.load %arg5[%c0_8, %c0_9, %c0_10] : memref<1x8x1xf32, #tpu.memory_space<vmem>>, vector<1x8x1xf32>
    %7 = vector.shape_cast %6 : vector<1x8x1xf32> to vector<8x1xf32>
    %c0_11 = arith.constant 0 : index
    %c0_12 = arith.constant 0 : index
    %c0_13 = arith.constant 0 : index
    %8 = vector.load %arg6[%c0_11, %c0_12, %c0_13] : memref<1x16x8xf32, #tpu.memory_space<vmem>>, vector<1x16x8xf32>
    %9 = vector.shape_cast %8 : vector<1x16x8xf32> to vector<16x8xf32>
    %cst = arith.constant dense<0.000000e+00> : vector<8x16xf32>
    %10 = tpu.matmul %3, %1, %cst {dimension_numbers = #tpu.dot_dimension_numbers<[1], [0], [0], [1], [0, 0, 1, 1], [], []>} : vector<8x3xf32>, vector<3x16xf32>, vector<8x16xf32> -> vector<8x16xf32>
    %11 = vector.broadcast %7 : vector<8x1xf32> to vector<8x16xf32>
    %12 = vector.broadcast %5 : vector<1x16xf32> to vector<8x16xf32>
    %13 = arith.addf %11, %12 : vector<8x16xf32>
    %cst_14 = arith.constant 2.000000e+00 : f32
    %14 = vector.broadcast %cst_14 : f32 to vector<8x16xf32>
    %15 = arith.mulf %14, %10 : vector<8x16xf32>
    %16 = arith.subf %13, %15 : vector<8x16xf32>
    %cst_15 = arith.constant 0.000000e+00 : f32
    %17 = vector.broadcast %cst_15 : f32 to vector<8x16xf32>
    %18 = arith.maximumf %16, %17 : vector<8x16xf32>
    %19 = tpu.iota {dimensions = array<i32: 0>} : vector<8x16xi32>
    %20 = tpu.bitcast %18 : vector<8x16xf32> -> vector<8x16xi32>
    %c-8_i32 = arith.constant -8 : i32
    %21 = vector.broadcast %c-8_i32 : i32 to vector<8x16xi32>
    %22 = arith.andi %20, %21 : vector<8x16xi32>
    %23 = arith.ori %22, %19 : vector<8x16xi32>
    %cst_16 = arith.constant 0.000000e+00 : f32
    %24 = vector.broadcast %cst_16 : f32 to vector<8x16xf32>
    %cst_17 = arith.constant 0.000000e+00 : f32
    %25 = vector.broadcast %cst_17 : f32 to vector<1x16xf32>
    %cst_18 = arith.constant dense<2147483647> : vector<16xi32>
    %26 = vector.multi_reduction <minsi>, %23, %cst_18 [0] : vector<8x16xi32> to vector<16xi32>
    %27 = vector.shape_cast %26 : vector<16xi32> to vector<1x16xi32>
    %28 = vector.broadcast %27 : vector<1x16xi32> to vector<8x16xi32>
    %29 = arith.cmpi eq, %23, %28 : vector<8x16xi32>
    %c-8_i32_19 = arith.constant -8 : i32
    %30 = vector.broadcast %c-8_i32_19 : i32 to vector<1x16xi32>
    %31 = arith.andi %27, %30 : vector<1x16xi32>
    %32 = tpu.bitcast %31 : vector<1x16xi32> -> vector<1x16xf32>
    %cst_20 = arith.constant 9.99999997E-7 : f32
    %33 = vector.broadcast %cst_20 : f32 to vector<1x16xf32>
    %34 = arith.maximumf %32, %33 : vector<1x16xf32>
    %cst_21 = arith.constant 1.000000e+00 : f32
    %35 = vector.broadcast %cst_21 : f32 to vector<1x16xf32>
    %36 = arith.divf %35, %34 : vector<1x16xf32>
    %cst_22 = arith.constant 0.000000e+00 : f32
    %37 = vector.shape_cast %36 : vector<1x16xf32> to vector<1x16xf32>
    %38 = vector.broadcast %37 : vector<1x16xf32> to vector<8x16xf32>
    %39 = vector.broadcast %cst_22 : f32 to vector<8x16xf32>
    %40 = arith.select %29, %38, %39 : vector<8x16xi1>, vector<8x16xf32>
    %41 = arith.addf %24, %40 : vector<8x16xf32>
    %42 = arith.addf %25, %36 : vector<1x16xf32>
    %c2147483647_i32 = arith.constant 2147483647 : i32
    %43 = vector.broadcast %c2147483647_i32 : i32 to vector<8x16xi32>
    %44 = arith.select %29, %43, %23 : vector<8x16xi1>, vector<8x16xi32>
    %cst_23 = arith.constant dense<2147483647> : vector<16xi32>
    %45 = vector.multi_reduction <minsi>, %44, %cst_23 [0] : vector<8x16xi32> to vector<16xi32>
    %46 = vector.shape_cast %45 : vector<16xi32> to vector<1x16xi32>
    %47 = vector.broadcast %46 : vector<1x16xi32> to vector<8x16xi32>
    %48 = arith.cmpi eq, %44, %47 : vector<8x16xi32>
    %c-8_i32_24 = arith.constant -8 : i32
    %49 = vector.broadcast %c-8_i32_24 : i32 to vector<1x16xi32>
    %50 = arith.andi %46, %49 : vector<1x16xi32>
    %51 = tpu.bitcast %50 : vector<1x16xi32> -> vector<1x16xf32>
    %cst_25 = arith.constant 9.99999997E-7 : f32
    %52 = vector.broadcast %cst_25 : f32 to vector<1x16xf32>
    %53 = arith.maximumf %51, %52 : vector<1x16xf32>
    %cst_26 = arith.constant 1.000000e+00 : f32
    %54 = vector.broadcast %cst_26 : f32 to vector<1x16xf32>
    %55 = arith.divf %54, %53 : vector<1x16xf32>
    %cst_27 = arith.constant 0.000000e+00 : f32
    %56 = vector.shape_cast %55 : vector<1x16xf32> to vector<1x16xf32>
    %57 = vector.broadcast %56 : vector<1x16xf32> to vector<8x16xf32>
    %58 = vector.broadcast %cst_27 : f32 to vector<8x16xf32>
    %59 = arith.select %48, %57, %58 : vector<8x16xi1>, vector<8x16xf32>
    %60 = arith.addf %41, %59 : vector<8x16xf32>
    %61 = arith.addf %42, %55 : vector<1x16xf32>
    %c2147483647_i32_28 = arith.constant 2147483647 : i32
    %62 = vector.broadcast %c2147483647_i32_28 : i32 to vector<8x16xi32>
    %63 = arith.select %48, %62, %44 : vector<8x16xi1>, vector<8x16xi32>
    %cst_29 = arith.constant dense<2147483647> : vector<16xi32>
    %64 = vector.multi_reduction <minsi>, %63, %cst_29 [0] : vector<8x16xi32> to vector<16xi32>
    %65 = vector.shape_cast %64 : vector<16xi32> to vector<1x16xi32>
    %66 = vector.broadcast %65 : vector<1x16xi32> to vector<8x16xi32>
    %67 = arith.cmpi eq, %63, %66 : vector<8x16xi32>
    %c-8_i32_30 = arith.constant -8 : i32
    %68 = vector.broadcast %c-8_i32_30 : i32 to vector<1x16xi32>
    %69 = arith.andi %65, %68 : vector<1x16xi32>
    %70 = tpu.bitcast %69 : vector<1x16xi32> -> vector<1x16xf32>
    %cst_31 = arith.constant 9.99999997E-7 : f32
    %71 = vector.broadcast %cst_31 : f32 to vector<1x16xf32>
    %72 = arith.maximumf %70, %71 : vector<1x16xf32>
    %cst_32 = arith.constant 1.000000e+00 : f32
    %73 = vector.broadcast %cst_32 : f32 to vector<1x16xf32>
    %74 = arith.divf %73, %72 : vector<1x16xf32>
    %cst_33 = arith.constant 0.000000e+00 : f32
    %75 = vector.shape_cast %74 : vector<1x16xf32> to vector<1x16xf32>
    %76 = vector.broadcast %75 : vector<1x16xf32> to vector<8x16xf32>
    %77 = vector.broadcast %cst_33 : f32 to vector<8x16xf32>
    %78 = arith.select %67, %76, %77 : vector<8x16xi1>, vector<8x16xf32>
    %79 = arith.addf %60, %78 : vector<8x16xf32>
    %80 = arith.addf %61, %74 : vector<1x16xf32>
    %cst_34 = arith.constant 1.000000e+00 : f32
    %81 = vector.broadcast %cst_34 : f32 to vector<1x16xf32>
    %82 = arith.divf %81, %80 : vector<1x16xf32>
    %83 = vector.broadcast %82 : vector<1x16xf32> to vector<8x16xf32>
    %84 = arith.mulf %79, %83 : vector<8x16xf32>
    %cst_35 = arith.constant dense<0.000000e+00> : vector<16x16xf32>
    %85 = tpu.matmul %9, %84, %cst_35 {dimension_numbers = #tpu.dot_dimension_numbers<[1], [0], [0], [1], [0, 0, 1, 1], [], []>} : vector<16x8xf32>, vector<8x16xf32>, vector<16x16xf32> -> vector<16x16xf32>
    %c0_36 = arith.constant 0 : index
    %c0_37 = arith.constant 0 : index
    %c0_38 = arith.constant 0 : index
    %86 = vector.load %arg7[%c0_36, %c0_37, %c0_38] : memref<1x16x16xf32, #tpu.memory_space<vmem>>, vector<1x16x16xf32>
    %87 = vector.shape_cast %86 : vector<1x16x16xf32> to vector<16x16xf32>
    %88 = vector.shape_cast %85 : vector<16x16xf32> to vector<1x16x16xf32>
    tpu.vector_store %arg7[%c0_36, %c0_37, %c0_38], %88 {strides = array<i32>} : memref<1x16x16xf32, #tpu.memory_space<vmem>>, vector<1x16x16xf32>,
    return
  }
  func.func @transform_0(%arg0: i32, %arg1: i32) -> (i32, i32, i32) {
    %c0_i32 = arith.constant 0 : i32
    %c0_i32_0 = arith.constant 0 : i32
    return %arg0, %c0_i32, %arg1 : i32, i32, i32
  }
  func.func @transform_1(%arg0: i32, %arg1: i32) -> (i32, i32, i32) {
    %c0_i32 = arith.constant 0 : i32
    %c0_i32_0 = arith.constant 0 : i32
    %c0_i32_1 = arith.constant 0 : i32
    return %arg0, %c0_i32, %c0_i32_0 : i32, i32, i32
  }
  func.func @transform_2(%arg0: i32, %arg1: i32) -> (i32, i32, i32) {
    %c0_i32 = arith.constant 0 : i32
    %c0_i32_0 = arith.constant 0 : i32
    return %arg0, %c0_i32, %arg1 : i32, i32, i32
  }
  func.func @transform_3(%arg0: i32, %arg1: i32) -> (i32, i32, i32) {
    %c0_i32 = arith.constant 0 : i32
    %c0_i32_0 = arith.constant 0 : i32
    %c0_i32_1 = arith.constant 0 : i32
    return %arg0, %c0_i32, %c0_i32_0 : i32, i32, i32
  }
  func.func @transform_4(%arg0: i32, %arg1: i32) -> (i32, i32, i32) {
    %c0_i32 = arith.constant 0 : i32
    %c0_i32_0 = arith.constant 0 : i32
    %c0_i32_1 = arith.constant 0 : i32
    return %arg0, %c0_i32, %c0_i32_0 : i32, i32, i32
  }
  func.func @transform_5(%arg0: i32, %arg1: i32) -> (i32, i32, i32) {
    %c0_i32 = arith.constant 0 : i32
    %c0_i32_0 = arith.constant 0 : i32
    return %arg0, %c0_i32, %arg1 : i32, i32, i32
  }
}

</mosaic_0001>

<bundles_post_ra>
// kernel: tpu_custom_call.1
= control target key start
LH: loop header
LB: loop body
LE: loop exit
PB: predicated region body
PF: predicated region fallthrough
CT: control target
= control target key end

     0   :  { %10 = vsyncpa [#allocation3], 0  ;;  %s1078_s0 = inlined_call_operand.vmem [shape: f32[2,3,16], index: 0, kind: input, shape index: {}]   ;;  %s1079_s1 = inlined_call_operand.vmem [shape: f32[2,8,3], index: 1, kind: input, shape index: {}]   ;;  %s1080_s2 = inlined_call_operand.vmem [shape: f32[2,1,16], index: 2, kind: input, shape index: {}]   ;;  %s1081_s3 = inlined_call_operand.vmem [shape: f32[2,8,1], index: 3, kind: input, shape index: {}]   ;;  %s1082_s4 = inlined_call_operand.vmem [shape: f32[2,16,8], index: 4, kind: input, shape index: {}]   ;;  %s1083_s5 = inlined_call_operand.hbm [shape: f32[2,16,16], index: 5, kind: output, shape index: {}]  }
   0x1   :  { %12 = vsyncpa [#allocation3 + $0x1], 0  ;;  %s936_s18 = smov 0   ;;  %s938_s19 = smov 0  }
   0x2   :  { %s940_s20 = smov 0   ;;  %s942_s21 = smov 0  }
   0x3   :  { %s944_s22 = smov 0   ;;  %s946_s23 = smov 0  }
   0x4 LB: > { %s713_s24 = sadd.s32 4294967295, %s898_s23   ;;  %s714_s25 = sadd.s32 4294967294, %s898_s23   ;;  %s898_s23 = sphi %s946_s23, %s18_s23   ;;  %s894_s22 = sphi %s944_s22, %s1090_s22   ;;  %s890_s21 = sphi %s942_s21, %s1089_s21   ;;  %s886_s20 = sphi %s940_s20, %s1088_s20   ;;  %s882_s19 = sphi %s938_s19, %s1087_s19   ;;  %s878_s18 = sphi %s936_s18, %s1086_s18  }
   0x5   : > { %s30_s26 = sadd.s32 1, %s894_s22  ;;  %s173_s27 = sadd.s32 1, %s886_s20 }
   0x6   : > { %p32_p0 = scmp.ge.s32.totalorder %s30_s26, 2  ;;  %p183_p1 = scmp.ne.s32.totalorder %s886_s20, %s882_s19 }
   0x7   : > { %p184_p2 = scmp.eq.s32.totalorder %s713_s24, 1  ;;  %p189_p3 = scmp.ne.s32.totalorder %s882_s19, %s878_s18 }
   0x8   : > { %s1092_s26 = smov (%p32_p0, %s30_s26), 0  ;;  %p190_p5 = scmp.eq.s32.totalorder %s714_s25, 1 }
   0x9   : > { %p976_p4 = por %p184_p2, %p183_p1  ;;  %s168_s29 = ssub.s32 %s894_s22, %s1092_s26 }
   0xa   : > { %p717_p6 = scmp.ge.s32.totalorder %s898_s23, 1  ;;  %p171_p7 = scmp.eq.s32.totalorder %s168_s29, 0 }
   0xb   : > { %p983_p8 = por %p190_p5, %p189_p3  ;;  %p249_p9 = scmp.lt.s32.totalorder %s898_s23, 3 }
   0xc   : > { %s989_s6 = scalar_select %p171_p7, %s886_s20, %s173_s27  }
   0xd   : > { %p250_p10 = pnand %p717_p6, %p249_p9 }
   0xe   : > { %p298_p11 = scmp.lt.s32.totalorder (!%p250_p10), %s890_s21, 1  ;;  %v900_v0 = vmov (!%p250_p10), 0.0   ;;  %vm901_vm0 = vmmov (!%p250_p10), 0   ;;  %v902_v1 = vmov (!%p250_p10), 0   ;;  %vm334_vm1 = vcmask (!%p250_p10), 1042432  }
   0xf   : > { %253 = sbr.rel (%p250_p10) target bundleno = 553 (0x229), region = 40  ;;  %741 = vmatprep.subr.mxu0 (!%p250_p10), %v900_v0  ;;  %743 = vmatprep.mubr.msk.f32.mxu0 (!%p250_p10), %vm901_vm0, %v900_v0  ;;  %vm330_vm2 = vcmask (!%p250_p10), 23552   ;;  %vm491_vm3 = vcmask (!%p250_p10), 64512   ;;  %v423_v11 = vlaneseq (!%p250_p10)  ;;  %vm428_vm4 = vcmask (!%p250_p10), 130048  }
  0x10   : > { %811 = vset.pattern.permute.xlu0 (!%p250_p10), %v902_v1 }
  0x11   : > { %v424_v15 = vshrl.u32 (!%p250_p10), %v423_v11, 7 }
  0x16   : > { %s299_s7 = scalar_select %p298_p11, %s890_s21, 1 }
  0x18   : > { %s719_s8 = sshll.u32 %s299_s7, 2  ;;  %s720_s9 = sshll.u32 %s299_s7, 3 }
  0x19   : > { %s304_s12 = scalar_lea.vmem %s1078_s0, %s719_s8  ;;  %s308_s15 = scalar_lea.vmem %s1079_s1, %s720_s9 }
  0x1a   : > { %v324_v2 = vld [vmem:[%s304_s12] sm:$0x7]  ;;  %s318_s24 = scalar_lea.vmem %s1081_s3, %s720_s9  ;;  %s734_s25 = sshll.u32 %s299_s7, 4 }
  0x1b   : > { %v325_v3 = vld [vmem:[%s308_s15] sm:$0xff]  ;;  %742 = vmatpush3.msk.msra.mxu0 %vm334_vm1, %v324_v2  ;;  %s1005_s8 = scalar_lea.vmem %s1082_s4, %s734_s25  ;;  %s314_s12 = scalar_lea.vmem %s1080_s2, %s299_s7 }
  0x1c   : > { %v327_v4 = vld [vmem:[%s318_s24] sm:$0xff]  ;;  %744 = vmatmul.mubr.msk.f32.vlgmr.msra.gmra.mrb[0].mxu0 %vm330_vm2, %v325_v3  ;;  %v329_v59 = vld [vmem:[%s1005_s8 + $0x8] sm:$0xff]  ;;  %s295_s7 = sand.u32 1, %s882_s19   ;;  %s735_s15 = sshll.u32 %s890_s21, 8 }
  0x1d   : > { %410 = vperm.xlu0 %811, %v327_v4   ;;  %v328_v5 = vld [vmem:[%s1005_s8] sm:$0xff]  ;;  %s718_s9 = sshll.u32 %s295_s7, 4  ;;  %s1028_s24 = scalar_lea.hbm %s1083_s5, %s735_s15 }
  0x1e   : > { %748 = vmatprep.mubr.msk.f32.mxu1 %vm491_vm3, %v328_v5  ;;  %v726_v6 = vld [vmem:[%s314_s12] ss:$0 sm:$0xff]  ;;  %s297_s13 = scalar_lea.vmem [#allocation2], %s718_s9  ;;  %s1032_s25 = scalar_lea.sflag [#allocation3], %s295_s7 }
  0x1f   : > { %s590_s14 = sshll.u32 %s297_s13, 4  ;;  %s903_s21 = smov [#allocation2]   ;;  %s1023_s14 = int_to_ptr.vmem [resolvable:$true] %s590_s14 }
  0x20   : > { %s820_s27 = scalar_lea.vmem %s1023_s14, 256  ;;  %s824_s29 = sshll.u32 %s903_s21, 4  ;;  %s825_s29 = int_to_ptr.vmem [resolvable:$false] %s824_s29 }
  0x21   : > { %p821_p12 = scmp.ne.s32.totalorder %s1023_s14, %s820_s27  ;;  %s826_s8 = scalar_lea.vmem %s825_s29, 512 }
  0x22   : > { %p827_p1 = scmp.lt.s32.totalorder %s1023_s14, %s825_s29  ;;  %p828_p2 = scmp.lt.s32.totalorder %s826_s8, %s820_s27 }
  0x23   : > { %p822_p13 = pnand %p821_p12, %p976_p4 }
  0x24   : > { %p829_p3 = por %p828_p2, %p827_p1 }
  0x25   : > { %p823_p0 = pneg %p822_p13 }
  0x27   : > { %p830_p5 = pnand %p829_p3, %p823_p0 }
  0x9c   : > { %v411_v7 = vpop.permute.xlu0 %410 }
  0x9d   : > { %v419_v8 = vadd.f32 %v726_v6, %v411_v7 }
  0xef   : > { %v404_v9 = vpop.f32.mrb[0].mxu0 }
  0xf0   : > { %v420_v10 = vmul.f32 2.0, %v404_v9  ;;  %v745_v12 = vpop.f32.mrb[1].mxu0 }
  0xf2   : > { %v421_v13 = vsub.f32 %v419_v8, %v420_v10 }
  0xf4   : > { %v422_v14 = vmax.f32 %v421_v13, 0.0 }
  0xf6   : > { %v426_v16 = vand.u32 4294967288, %v422_v14 }
  0xf8   : > { %v427_v17 = vor.u32 %v426_v16, %v424_v15 }
  0xfa   : > { %v429_v18 = vsel %vm428_vm4, %v427_v17, 2147483647 }
  0xfb   : > { %v430_v19 = vrot.slane %v429_v18, 4 }
  0xfd   : > { %vm431_vm5 = vcmp.lt.s32.totalorder %v429_v18, %v430_v19 }
  0xfe   : > { %v432_v20 = vsel %vm431_vm5, %v429_v18, %v430_v19 }
  0xff   : > { %v433_v21 = vrot.slane %v432_v20, 2 }
 0x101   : > { %vm434_vm6 = vcmp.lt.s32.totalorder %v432_v20, %v433_v21 }
 0x102   : > { %v435_v22 = vsel %vm434_vm6, %v432_v20, %v433_v21 }
 0x103   : > { %v436_v23 = vrot.slane %v435_v22, 1 }
 0x105   : > { %vm437_vm7 = vcmp.lt.s32.totalorder %v435_v22, %v436_v23 }
 0x106   : > { %v438_v24 = vsel %vm437_vm7, %v435_v22, %v436_v23 }
 0x107   : > { %vm439_vm8 = vcmp.eq.s32.totalorder %v427_v17, %v438_v24  ;;  %v440_v39 = vand.u32 4294967288, %v438_v24 }
 0x108   : > { %v448_v25 = vsel %vm439_vm8, 2147483647, %v427_v17 }
 0x109   : > { %v449_v26 = vsel %vm428_vm4, %v448_v25, 2147483647  ;;  %v442_v43 = vmax.f32 %v440_v39, 1e-06 }
 0x10a   : > { %v450_v27 = vrot.slane %v449_v26, 4 }
 0x10c   : > { %vm451_vm9 = vcmp.lt.s32.totalorder %v449_v26, %v450_v27 }
 0x10d   : > { %v452_v28 = vsel %vm451_vm9, %v449_v26, %v450_v27 }
 0x10e   : > { %v453_v29 = vrot.slane %v452_v28, 2 }
 0x110   : > { %vm454_vm10 = vcmp.lt.s32.totalorder %v452_v28, %v453_v29 }
 0x111   : > { %v455_v30 = vsel %vm454_vm10, %v452_v28, %v453_v29 }
 0x112   : > { %v456_v31 = vrot.slane %v455_v30, 1 }
 0x114   : > { %vm457_vm11 = vcmp.lt.s32.totalorder %v455_v30, %v456_v31 }
 0x115   : > { %v458_v32 = vsel %vm457_vm11, %v455_v30, %v456_v31 }
 0x116   : > { %vm459_vm12 = vcmp.eq.s32.totalorder %v448_v25, %v458_v32  ;;  %v460_v37 = vand.u32 4294967288, %v458_v32 }
 0x117   : > { %v468_v33 = vsel %vm459_vm12, 2147483647, %v448_v25 }
 0x118   : > { %v469_v34 = vsel %vm428_vm4, %v468_v33, 2147483647  ;;  %v462_v41 = vmax.f32 %v460_v37, 1e-06 }
 0x119   : > { %v470_v35 = vrot.slane %v469_v34, 4 }
 0x11a   : > { %812 = vrcp.f32 %v462_v41 }
 0x11b   : > { %vm471_vm13 = vcmp.lt.s32.totalorder %v469_v34, %v470_v35  ;;  %814 = vrcp.f32 %v442_v43 }
 0x11c   : > { %v472_v36 = vsel %vm471_vm13, %v469_v34, %v470_v35 }
 0x11d   : > { %v473_v38 = vrot.slane %v472_v36, 2 }
 0x11f   : > { %vm474_vm14 = vcmp.lt.s32.totalorder %v472_v36, %v473_v38 }
 0x120   : > { %v475_v40 = vsel %vm474_vm14, %v472_v36, %v473_v38 }
 0x121   : > { %v476_v42 = vrot.slane %v475_v40, 1 }
 0x123   : > { %vm477_vm15 = vcmp.lt.s32.totalorder %v475_v40, %v476_v42 }
 0x124   : > { %v478_v44 = vsel %vm477_vm15, %v475_v40, %v476_v42  ;;  %v813_v47 = vpop.eup %812 }
 0x125   : > { %v480_v45 = vand.u32 4294967288, %v478_v44  ;;  %v815_v48 = vpop.eup %814  ;;  %v465_v52 = vsel %vm459_vm12, %v813_v47, 0.0  ;;  %vm479_vm0 = vcmp.eq.s32.totalorder %v468_v33, %v478_v44 }
 0x126   : > { %v467_v49 = vadd.f32 %v815_v48, %v813_v47  ;;  %v445_v53 = vsel %vm439_vm8, %v815_v48, 0.0 }
 0x127   : > { %v482_v46 = vmax.f32 %v480_v45, 1e-06  ;;  %v466_v55 = vadd.f32 %v465_v52, %v445_v53 }
 0x129   : > { %816 = vrcp.f32 %v482_v46 }
 0x133   : > { %v817_v50 = vpop.eup %816 }
 0x134   : > { %v487_v51 = vadd.f32 %v817_v50, %v467_v49  ;;  %v485_v54 = vsel %vm479_vm0, %v817_v50, 0.0 }
 0x135   : > { %v486_v56 = vadd.f32 %v485_v54, %v466_v55 }
 0x136   : > { %818 = vrcp.f32 %v487_v51 }
 0x140   : > { %v819_v57 = vpop.eup %818 }
 0x141   : > { %v490_v58 = vmul.f32 %v819_v57, %v486_v56 }
 0x143   : > { %746 = vmatprep.subr.mxu1 %v490_v58 }
 0x144   : > { %747 = vmatpush3.msra.mxu1 %v490_v58 }
 0x145   : > { %749 = vmatmul.mubr.msk.f32.vlgmr.msra.gmra.mrb[0].mxu1 %vm491_vm3, %v329_v59 }
 0x218   : > { %v750_v60 = vpop.f32.mrb[0].mxu1 }
 0x219   : > { %574 = vst.msk [vmem:[%s297_s13 + $0x8] sm:$0xff] %vm428_vm4, %v750_v60  ;;  %v564_v61 = vpop.f32.mrb[1].mxu1 }
 0x21a   : > { %573 = vst.msk [vmem:[%s297_s13] sm:$0xff] %vm428_vm4, %v564_v61 }
 0x21b   : > { %833 = shalt.err (!%p830_p5)
}
 0x21c   : > { %s834_s10 = scalar_lea.hbm %s1028_s24, 256  ;;  %s838_s7 = scalar_lea.hbm %s1083_s5, 512 }
 0x21d   : > { %p835_p6 = scmp.ne.s32.totalorder %s1028_s24, %s834_s10  ;;  %p839_p10 = scmp.lt.u32.totalorder %s1028_s24, %s1083_s5 }
 0x21e   : > { %p840_p11 = scmp.lt.u32.totalorder %s838_s7, %s834_s10  ;;  %p842_p13 = scmp.lt.u32.totalorder %s834_s10, %s1028_s24 }
 0x21f   : > { %p836_p7 = pnand %p835_p6, %p976_p4 }
 0x220   : > { %p841_p12 = por %p840_p11, %p839_p10 }
 0x221   : > { %p837_p9 = pneg %p836_p7 }
 0x222   : > { %p843_p0 = por %p842_p13, %p841_p12 }
 0x224   : > { %p844_p1 = pnand %p843_p0, %p837_p9 }
 0x226   : > { %847 = shalt.err (!%p844_p1)
}
 0x227   : > { %s904_s15 = smov 128   ;;  %s905_s16 = smov 8  }
 0x228   : > { %751 = dma.vmem_to_hbm [thread:$0]  (%p976_p4), %s1023_s14, 256, %s1028_s24, %s1032_s25, %s904_s15, %s904_s15, %s905_s16  }
 0x229 PF: > { %p757_p2 = scmp.ge.s32.totalorder %s898_s23, 2  ;;  %s605_s17 = sand.u32 1, %s878_s18  }
 0x22a   : > { %s606_s27 = scalar_lea.sflag [#allocation3], %s605_s17 }
 0x22b   : > { %p754_p3 = pnand %p757_p2, %p983_p8 }
 0x22d   : > { %873 = dma.done.wait (!%p754_p3), %s606_s27, 256  }
 0x22e   : > { %875 = vsyncadd (!%p754_p3), %s606_s27, 4294967040  ;;  %s18_s23 = sadd.s32 1, %s898_s23   ;;  %s1086_s18 = smov %s882_s19 }
 0x22f   : > { %p15_p5 = scmp.ge.s32.totalorder %s18_s23, 4   ;;  %s1087_s19 = smov %s886_s20 }
 0x230   : > { %s1088_s20 = smov %s989_s6  ;;  %s1089_s21 = smov %s894_s22 }
 0x231   : > { %s1090_s22 = smov %s1092_s26  ;;  %17 = sbr.rel (!%p15_p5) target bundleno = 4 (0x4), region = 87 }
 0x238   :  { %611 = vsyncpa [#allocation3], 1 }
 0x239   :  { %613 = vsyncpa [#allocation3 + $0x1], 1 }

</bundles_post_ra>
